<compile_context>
chip_gen: v5e
topology: v5e:2x2
jax: 0.10.0
libtpu: 0.0.40
codegen_flags: <defaults>
</compile_context>

<pallas_src>
import functools

import jax
import jax.numpy as jnp
from jax import lax
from jax.experimental import pallas as pl
from jax.experimental.pallas import tpu as pltpu


def _round_up(n, m):
    return -(-n // m) * m


def _bolt_loss_kernel(logits_ref, labels_ref, cls_ref, out_ref, *,
                      num_windows, hidden, batch):
    """Writes per-tile partials: out_ref[0,0]=sum(CE), out_ref[0,1]=sum(SSE)."""
    pid = pl.program_id(0)
    tb, num_classes = logits_ref.shape

    # Row-validity mask for the ragged final tile (OOB block rows are
    # undefined, so every reduction below is masked per row).
    row_ids = lax.broadcasted_iota(jnp.int32, (tb, 1), 0) + pid * tb
    valid = row_ids < batch

    # ---- cross-entropy partial sum (mean applied in the wrapper) ----------
    logits = logits_ref[...].astype(jnp.float32)                 # (TB, C)
    labels = labels_ref[...]                                     # (TB, 1) int32
    m = jnp.max(logits, axis=-1, keepdims=True)                  # (TB, 1)
    lse = jnp.log(jnp.sum(jnp.exp(logits - m), axis=-1, keepdims=True)) + m
    class_ids = lax.broadcasted_iota(jnp.int32, (tb, num_classes), 1)
    picked = jnp.sum(jnp.where(class_ids == labels, logits, 0.0),
                     axis=-1, keepdims=True)                     # (TB, 1)
    per_sample = lse - picked                                    # (TB, 1)
    ce_partial = jnp.sum(jnp.where(valid, per_sample, 0.0))

    # ---- CLS-token consistency partial sum (two-pass, lane-dense) ---------
    # cls arrives flattened to (TB, W*D); slice W lane chunks of width D.
    x = cls_ref[...].astype(jnp.float32)                         # (TB, W*D)
    w_sum = x[:, 0:hidden]
    for w in range(1, num_windows):
        w_sum = w_sum + x[:, w * hidden:(w + 1) * hidden]
    w_mean = w_sum * (1.0 / num_windows)                         # (TB, D)
    sq = jnp.zeros_like(w_mean)
    for w in range(num_windows):
        d = x[:, w * hidden:(w + 1) * hidden] - w_mean
        sq = sq + d * d
    sse_rows = jnp.sum(sq, axis=-1, keepdims=True)               # (TB, 1)
    sse_partial = jnp.sum(jnp.where(valid, sse_rows, 0.0))

    out_ref[0, 0] = ce_partial
    out_ref[0, 1] = sse_partial


def bolt_loss(logits, cls, y, lambda_cons, *, max_tile_rows=1024):
    """BolT loss.

    logits: (B, C) float32/bfloat16, cls: (B, W, D) float32/bfloat16,
    y: (B,) int labels. bf16 inputs are supported and halve HBM traffic;
    all math is done in f32 per tile inside the kernel.
    """
    B, C = logits.shape
    Bc, W, D = cls.shape
    assert Bc == B, (logits.shape, cls.shape)

    lbytes = jnp.dtype(logits.dtype).itemsize
    cbytes = jnp.dtype(cls.dtype).itemsize

    # Generation-aware VMEM budgeting (v7x has only 64 MiB per TensorCore).
    try:
        vmem_cap = int(pltpu.get_tpu_info().vmem_capacity_bytes)
    except Exception:  # pragma: no cover - conservative fallback
        vmem_cap = 64 * 1024 * 1024
    if vmem_cap <= 64 * 1024 * 1024:          # v7x
        vmem_limit = 40 * 1024 * 1024
        tile_budget = 16 * 1024 * 1024
    else:                                     # v5e / v6e (128 MiB physical)
        vmem_limit = 64 * 1024 * 1024
        tile_budget = 24 * 1024 * 1024

    # Per-row VMEM bytes using lane-padded (128-wide) block widths,
    # x2 for double-buffered input blocks, plus ~2x W*D f32 for the cast /
    # diff / square temporaries the compiler materializes per tile.
    row_bytes = (_round_up(C, 128) * lbytes          # logits block
                 + 128 * 4                           # (TB, 1) int32 labels
                 + _round_up(W * D, 128) * cbytes)   # flattened cls block
    per_row = 2 * row_bytes + 2 * _round_up(W * D, 128) * 4
    tb = (tile_budget // per_row) // 8 * 8
    tb = int(max(8, min(max_tile_rows, tb)))
    if B <= tb:
        tb = B                                 # single full-extent block
    num_tiles = int(pl.cdiv(B, tb))            # ragged last block, no padding

    # Lane-dense flat layout for cls: free contiguous reshape, no HBM copy.
    cls_flat = cls.reshape(B, W * D)
    labels2d = y.astype(jnp.int32).reshape(B, 1)

    kernel = functools.partial(_bolt_loss_kernel,
                               num_windows=W, hidden=D, batch=B)

    grid_spec = pltpu.PrefetchScalarGridSpec(
        num_scalar_prefetch=0,
        grid=(num_tiles,),
        in_specs=[
            pl.BlockSpec((tb, C), lambda i: (i, 0)),
            pl.BlockSpec((tb, 1), lambda i: (i, 0)),
            pl.BlockSpec((tb, W * D), lambda i: (i, 0)),
        ],
        out_specs=pl.BlockSpec((1, 2), lambda i: (i, 0),
                               memory_space=pltpu.SMEM),
    )

    cost = pl.CostEstimate(
        flops=8 * B * C + 5 * B * W * D,
        transcendentals=B * (C + 1),
        bytes_accessed=B * (C * lbytes + W * D * cbytes + 4) + 8 * num_tiles,
    )

    partials = pl.pallas_call(
        kernel,
        out_shape=jax.ShapeDtypeStruct((num_tiles, 2), jnp.float32),
        grid_spec=grid_spec,
        compiler_params=pltpu.CompilerParams(
            dimension_semantics=("parallel",),   # independent per-tile partials
            vmem_limit_bytes=vmem_limit,
        ),
        cost_estimate=cost,
    )(logits, labels2d, cls_flat)

    ce_loss = jnp.sum(partials[:, 0]) / B
    cls_loss = jnp.sum(partials[:, 1]) / (B * W * D)
    return ce_loss + lambda_cons * cls_loss


def _reference_loss(logits, cls, y, lambda_cons):
    logits = logits.astype(jnp.float32)
    log_probs = jax.nn.log_softmax(logits, axis=-1)
    ce = -jnp.mean(jnp.take_along_axis(log_probs, y[:, None], axis=-1))
    cls = cls.astype(jnp.float32)
    cls_loss = jnp.mean(jnp.square(cls - jnp.mean(cls, axis=1, keepdims=True)))
    return ce + lambda_cons * cls_loss


if __name__ == "__main__":
    key = jax.random.PRNGKey(0)
    k1, k2, k3 = jax.random.split(key, 3)

    B, C = 2, 4          # batch, num classes
    W, D = 8, 32         # windows, hidden dim
    lambda_cons = 0.5

    logits = jax.random.normal(k1, (B, C), dtype=jnp.float32)
    cls = jax.random.normal(k2, (B, W, D), dtype=jnp.float32)
    y = jax.random.randint(k3, (B,), 0, C, dtype=jnp.int32)

    loss = bolt_loss(logits, cls, y, lambda_cons)
    loss = jax.block_until_ready(loss)
    ref = _reference_loss(logits, cls, y, lambda_cons)
    assert jnp.allclose(loss, ref, rtol=1e-4, atol=1e-5), (loss, ref)

    # Exercise the multi-tile / ragged-tail path (grid > 1, B % tb != 0).
    k4, k5, k6 = jax.random.split(jax.random.PRNGKey(1), 3)
    B2 = 20
    logits2 = jax.random.normal(k4, (B2, C), dtype=jnp.float32)
    cls2 = jax.random.normal(k5, (B2, W, D), dtype=jnp.float32)
    y2 = jax.random.randint(k6, (B2,), 0, C, dtype=jnp.int32)

    loss2 = bolt_loss(logits2, cls2, y2, lambda_cons, max_tile_rows=8)
    loss2 = jax.block_until_ready(loss2)
    ref2 = _reference_loss(logits2, cls2, y2, lambda_cons)
    assert jnp.allclose(loss2, ref2, rtol=1e-4, atol=1e-5), (loss2, ref2)

    # bf16 inputs (kernel casts to f32 per tile; only HBM traffic narrows).
    loss3 = bolt_loss(logits2.astype(jnp.bfloat16), cls2.astype(jnp.bfloat16),
                      y2, lambda_cons, max_tile_rows=8)
    loss3 = jax.block_until_ready(loss3)
    ref3 = _reference_loss(logits2.astype(jnp.bfloat16),
                           cls2.astype(jnp.bfloat16), y2, lambda_cons)
    assert jnp.allclose(loss3, ref3, rtol=2e-2, atol=2e-2), (loss3, ref3)

    print("KERNEL_OK")
</pallas_src>

<mosaic_0001>
module attributes {stable_mosaic.version = 11 : i64} {
  func.func @_bolt_loss_kernel(%arg0: i32, %arg1: memref<2x4xf32, #tpu.memory_space<vmem>>, %arg2: memref<2x1xi32, #tpu.memory_space<vmem>>, %arg3: memref<2x256xf32, #tpu.memory_space<vmem>>, %arg4: memref<1x2xf32, #tpu.memory_space<smem>>) attributes {dimension_semantics = [#tpu.dimension_semantics<parallel>], iteration_bounds = array<i64: 1>, scalar_prefetch = 0 : i64, scratch_operands = 0 : i64, tpu.core_type = #tpu.core_type<tc>, window_params = [{transform_indices = @transform_0, window_bounds = array<i64: 2, 4>}, {transform_indices = @transform_1, window_bounds = array<i64: 2, 1>}, {transform_indices = @transform_2, window_bounds = array<i64: 2, 256>}, {transform_indices = @transform_3, window_bounds = array<i64: 1, 2>}]} {
    %0 = tpu.iota {dimensions = array<i32: 0>} : vector<2x1xi32>
    %c2_i32 = arith.constant 2 : i32
    %1 = arith.muli %arg0, %c2_i32 : i32
    %2 = vector.broadcast %1 : i32 to vector<2x1xi32>
    %3 = arith.addi %0, %2 : vector<2x1xi32>
    %c2_i32_0 = arith.constant 2 : i32
    %4 = vector.broadcast %c2_i32_0 : i32 to vector<2x1xi32>
    %5 = arith.cmpi slt, %3, %4 : vector<2x1xi32>
    %c0 = arith.constant 0 : index
    %c0_1 = arith.constant 0 : index
    %6 = vector.load %arg1[%c0, %c0_1] : memref<2x4xf32, #tpu.memory_space<vmem>>, vector<2x4xf32>
    %c0_2 = arith.constant 0 : index
    %c0_3 = arith.constant 0 : index
    %7 = vector.load %arg2[%c0_2, %c0_3] : memref<2x1xi32, #tpu.memory_space<vmem>>, vector<2x1xi32>
    %cst = arith.constant dense<0xFF800000> : vector<2xf32>
    %8 = vector.multi_reduction <maximumf>, %6, %cst [1] : vector<2x4xf32> to vector<2xf32>
    %9 = vector.shape_cast %8 : vector<2xf32> to vector<2x1xf32>
    %10 = vector.broadcast %9 : vector<2x1xf32> to vector<2x4xf32>
    %11 = arith.subf %6, %10 : vector<2x4xf32>
    %12 = math.exp %11 : vector<2x4xf32>
    %cst_4 = arith.constant dense<0.000000e+00> : vector<2xf32>
    %13 = vector.multi_reduction <add>, %12, %cst_4 [1] : vector<2x4xf32> to vector<2xf32>
    %14 = vector.shape_cast %13 : vector<2xf32> to vector<2x1xf32>
    %15 = math.log %14 : vector<2x1xf32>
    %16 = arith.addf %15, %9 : vector<2x1xf32>
    %17 = tpu.iota {dimensions = array<i32: 1>} : vector<2x4xi32>
    %18 = vector.broadcast %7 : vector<2x1xi32> to vector<2x4xi32>
    %19 = arith.cmpi eq, %17, %18 : vector<2x4xi32>
    %cst_5 = arith.constant 0.000000e+00 : f32
    %20 = vector.broadcast %cst_5 : f32 to vector<2x4xf32>
    %21 = arith.select %19, %6, %20 : vector<2x4xi1>, vector<2x4xf32>
    %cst_6 = arith.constant dense<0.000000e+00> : vector<2xf32>
    %22 = vector.multi_reduction <add>, %21, %cst_6 [1] : vector<2x4xf32> to vector<2xf32>
    %23 = vector.shape_cast %22 : vector<2xf32> to vector<2x1xf32>
    %24 = arith.subf %16, %23 : vector<2x1xf32>
    %cst_7 = arith.constant 0.000000e+00 : f32
    %25 = vector.broadcast %cst_7 : f32 to vector<2x1xf32>
    %26 = arith.select %5, %24, %25 : vector<2x1xi1>, vector<2x1xf32>
    %27 = vector.shape_cast %26 : vector<2x1xf32> to vector<1x2x1xf32>
    %cst_8 = arith.constant dense<0.000000e+00> : vector<1xf32>
    %28 = vector.multi_reduction <add>, %27, %cst_8 [1, 2] : vector<1x2x1xf32> to vector<1xf32>
    %29 = vector.shape_cast %28 : vector<1xf32> to vector<1x1x1xf32>
    %30 = vector.extract %29[0, 0, 0] : f32 from vector<1x1x1xf32>
    %c0_9 = arith.constant 0 : index
    %c0_10 = arith.constant 0 : index
    %31 = vector.load %arg3[%c0_9, %c0_10] : memref<2x256xf32, #tpu.memory_space<vmem>>, vector<2x256xf32>
    %32 = vector.extract_strided_slice %31 {offsets = [0, 0], sizes = [2, 32], strides = [1, 1]} : vector<2x256xf32> to vector<2x32xf32>
    %33 = vector.extract_strided_slice %31 {offsets = [0, 32], sizes = [2, 32], strides = [1, 1]} : vector<2x256xf32> to vector<2x32xf32>
    %34 = arith.addf %32, %33 : vector<2x32xf32>
    %35 = vector.extract_strided_slice %31 {offsets = [0, 64], sizes = [2, 32], strides = [1, 1]} : vector<2x256xf32> to vector<2x32xf32>
    %36 = arith.addf %34, %35 : vector<2x32xf32>
    %37 = vector.extract_strided_slice %31 {offsets = [0, 96], sizes = [2, 32], strides = [1, 1]} : vector<2x256xf32> to vector<2x32xf32>
    %38 = arith.addf %36, %37 : vector<2x32xf32>
    %39 = vector.extract_strided_slice %31 {offsets = [0, 128], sizes = [2, 32], strides = [1, 1]} : vector<2x256xf32> to vector<2x32xf32>
    %40 = arith.addf %38, %39 : vector<2x32xf32>
    %41 = vector.extract_strided_slice %31 {offsets = [0, 160], sizes = [2, 32], strides = [1, 1]} : vector<2x256xf32> to vector<2x32xf32>
    %42 = arith.addf %40, %41 : vector<2x32xf32>
    %43 = vector.extract_strided_slice %31 {offsets = [0, 192], sizes = [2, 32], strides = [1, 1]} : vector<2x256xf32> to vector<2x32xf32>
    %44 = arith.addf %42, %43 : vector<2x32xf32>
    %45 = vector.extract_strided_slice %31 {offsets = [0, 224], sizes = [2, 32], strides = [1, 1]} : vector<2x256xf32> to vector<2x32xf32>
    %46 = arith.addf %44, %45 : vector<2x32xf32>
    %cst_11 = arith.constant 1.250000e-01 : f32
    %47 = vector.broadcast %cst_11 : f32 to vector<2x32xf32>
    %48 = arith.mulf %46, %47 : vector<2x32xf32>
    %cst_12 = arith.constant 0.000000e+00 : f32
    %49 = vector.broadcast %cst_12 : f32 to vector<2x32xf32>
    %50 = vector.extract_strided_slice %31 {offsets = [0, 0], sizes = [2, 32], strides = [1, 1]} : vector<2x256xf32> to vector<2x32xf32>
    %51 = arith.subf %50, %48 : vector<2x32xf32>
    %52 = arith.mulf %51, %51 : vector<2x32xf32>
    %53 = arith.addf %49, %52 : vector<2x32xf32>
    %54 = vector.extract_strided_slice %31 {offsets = [0, 32], sizes = [2, 32], strides = [1, 1]} : vector<2x256xf32> to vector<2x32xf32>
    %55 = arith.subf %54, %48 : vector<2x32xf32>
    %56 = arith.mulf %55, %55 : vector<2x32xf32>
    %57 = arith.addf %53, %56 : vector<2x32xf32>
    %58 = vector.extract_strided_slice %31 {offsets = [0, 64], sizes = [2, 32], strides = [1, 1]} : vector<2x256xf32> to vector<2x32xf32>
    %59 = arith.subf %58, %48 : vector<2x32xf32>
    %60 = arith.mulf %59, %59 : vector<2x32xf32>
    %61 = arith.addf %57, %60 : vector<2x32xf32>
    %62 = vector.extract_strided_slice %31 {offsets = [0, 96], sizes = [2, 32], strides = [1, 1]} : vector<2x256xf32> to vector<2x32xf32>
    %63 = arith.subf %62, %48 : vector<2x32xf32>
    %64 = arith.mulf %63, %63 : vector<2x32xf32>
    %65 = arith.addf %61, %64 : vector<2x32xf32>
    %66 = vector.extract_strided_slice %31 {offsets = [0, 128], sizes = [2, 32], strides = [1, 1]} : vector<2x256xf32> to vector<2x32xf32>
    %67 = arith.subf %66, %48 : vector<2x32xf32>
    %68 = arith.mulf %67, %67 : vector<2x32xf32>
    %69 = arith.addf %65, %68 : vector<2x32xf32>
    %70 = vector.extract_strided_slice %31 {offsets = [0, 160], sizes = [2, 32], strides = [1, 1]} : vector<2x256xf32> to vector<2x32xf32>
    %71 = arith.subf %70, %48 : vector<2x32xf32>
    %72 = arith.mulf %71, %71 : vector<2x32xf32>
    %73 = arith.addf %69, %72 : vector<2x32xf32>
    %74 = vector.extract_strided_slice %31 {offsets = [0, 192], sizes = [2, 32], strides = [1, 1]} : vector<2x256xf32> to vector<2x32xf32>
    %75 = arith.subf %74, %48 : vector<2x32xf32>
    %76 = arith.mulf %75, %75 : vector<2x32xf32>
    %77 = arith.addf %73, %76 : vector<2x32xf32>
    %78 = vector.extract_strided_slice %31 {offsets = [0, 224], sizes = [2, 32], strides = [1, 1]} : vector<2x256xf32> to vector<2x32xf32>
    %79 = arith.subf %78, %48 : vector<2x32xf32>
    %80 = arith.mulf %79, %79 : vector<2x32xf32>
    %81 = arith.addf %77, %80 : vector<2x32xf32>
    %cst_13 = arith.constant dense<0.000000e+00> : vector<2xf32>
    %82 = vector.multi_reduction <add>, %81, %cst_13 [1] : vector<2x32xf32> to vector<2xf32>
    %83 = vector.shape_cast %82 : vector<2xf32> to vector<2x1xf32>
    %cst_14 = arith.constant 0.000000e+00 : f32
    %84 = vector.broadcast %cst_14 : f32 to vector<2x1xf32>
    %85 = arith.select %5, %83, %84 : vector<2x1xi1>, vector<2x1xf32>
    %86 = vector.shape_cast %85 : vector<2x1xf32> to vector<1x2x1xf32>
    %cst_15 = arith.constant dense<0.000000e+00> : vector<1xf32>
    %87 = vector.multi_reduction <add>, %86, %cst_15 [1, 2] : vector<1x2x1xf32> to vector<1xf32>
    %88 = vector.shape_cast %87 : vector<1xf32> to vector<1x1x1xf32>
    %89 = vector.extract %88[0, 0, 0] : f32 from vector<1x1x1xf32>
    %c0_16 = arith.constant 0 : index
    %c0_17 = arith.constant 0 : index
    %90 = memref.load %arg4[%c0_16, %c0_17] : memref<1x2xf32, #tpu.memory_space<smem>>
    memref.store %30, %arg4[%c0_16, %c0_17] : memref<1x2xf32, #tpu.memory_space<smem>>
    %c0_18 = arith.constant 0 : index
    %c1 = arith.constant 1 : index
    %91 = memref.load %arg4[%c0_18, %c1] : memref<1x2xf32, #tpu.memory_space<smem>>
    memref.store %89, %arg4[%c0_18, %c1] : memref<1x2xf32, #tpu.memory_space<smem>>
    return
  }
  func.func @transform_0(%arg0: i32) -> (i32, i32) {
    %c0_i32 = arith.constant 0 : i32
    %c0_i32_0 = arith.constant 0 : i32
    return %arg0, %c0_i32 : i32, i32
  }
  func.func @transform_1(%arg0: i32) -> (i32, i32) {
    %c0_i32 = arith.constant 0 : i32
    %c0_i32_0 = arith.constant 0 : i32
    return %arg0, %c0_i32 : i32, i32
  }
  func.func @transform_2(%arg0: i32) -> (i32, i32) {
    %c0_i32 = arith.constant 0 : i32
    %c0_i32_0 = arith.constant 0 : i32
    return %arg0, %c0_i32 : i32, i32
  }
  func.func @transform_3(%arg0: i32) -> (i32, i32) {
    %c0_i32 = arith.constant 0 : i32
    %c0_i32_0 = arith.constant 0 : i32
    return %arg0, %c0_i32 : i32, i32
  }
}

</mosaic_0001>

<bundles_post_ra>
// kernel: tpu_custom_call.1
= control target key start
LH: loop header
LB: loop body
LE: loop exit
PB: predicated region body
PF: predicated region fallthrough
CT: control target
= control target key end

     0   :  { %8 = vsyncpa [#allocation3], 0  ;;  %s298_s0 = inlined_call_operand.hbm [shape: f32[2,4], index: 0, kind: input, shape index: {}]   ;;  %s299_s1 = inlined_call_operand.vmem [shape: s32[2,1], index: 1, kind: input, shape index: {}]   ;;  %s300_s2 = inlined_call_operand.vmem [shape: f32[2,256], index: 2, kind: input, shape index: {}]   ;;  %s301_s3 = inlined_call_operand.hbm [shape: f32[1,2], index: 3, kind: output, shape index: {}]  }
   0x1   :  { %9 = vsyncpa [#allocation4], 0  ;;  %s15_s14 = sshll.u32 %s298_s0, 4  ;;  %s237_s15 = smov [#allocation2]   ;;  %s16_s14 = int_to_ptr.hbm [resolvable:$true] %s15_s14 }
   0x2   :  { %s17_s16 = sshll.u32 %s237_s15, 4  ;;  %s18_s16 = int_to_ptr.vmem [resolvable:$true] %s17_s16 }
   0x3   :  { %20 = dma.hbm_to_vmem [thread:$0]  %s16_s14, 32, %s18_s16, [#allocation3]  }
   0x4   :  { %233 = dma.done.wait [#allocation3], 32  }
   0x5   :  { %234 = vsyncadd [#allocation3], 4294967264  ;;  %v269_v0 = vld [vmem:[%s300_s2] sm:$0xf]  ;;  %s238_s19 = smov 96   ;;  %s239_s20 = smov 32   ;;  %v29_v39 = vlaneseq }
   0x6   :  { %75 = vrot.lane.b32.xlu0 %v269_v0, %s238_s19  ;;  %83 = vrot.lane.b32.xlu1 %v269_v0, %s239_s20  ;;  %s240_s0 = smov 64   ;;  %v35_v1 = vld [vmem:[#allocation2] sm:$0x3]  ;;  %vm37_vm0 = vcmask 25600   ;;  %v87_v8 = vrot.slane %v269_v0, 2  ;;  %v241_v22 = vmov 0  }
   0x7   :  { %v38_v3 = vsel %vm37_vm0, %v35_v1, -inf  ;;  %191 = vset.pattern.permute.xlu2 %v241_v22  ;;  %192 = vset.pattern.permute.xlu0 %v241_v22  ;;  %v36_v26 = vld [vmem:[%s299_s1] sm:$0x3]  ;;  %v51_v40 = vand.u32 127, %v29_v39  ;;  %vm146_vm2 = vcmask 254976   ;;  %v30_v63 = vshrl.u32 %v29_v39, 7 }
   0x8   :  { %vm62_vm4 = vcmask 1024   ;;  %s170_s24 = sshll.u32 %s301_s3, 4  ;;  %s242_s26 = smov [#allocation5]   ;;  %s171_s24 = int_to_ptr.hbm [resolvable:$true] %s170_s24 }
   0x9   :  { %vm34_vm3 = vcmp.lt.s32.totalorder %v30_v63, 2 }
   0xe   :  { %79 = vrot.lane.b32.xlu0 %v269_v0, %s240_s0 }
  0x38   :  { %39 = vmax.xlane.f32.xlu0 %v38_v3 }
  0x78   :  { %v76_v2 = vpop.permute.xlu0 %75  ;;  %v84_v6 = vpop.permute.xlu1 %83 }
  0x79   :  { %v78_v4 = vadd.f32 %v76_v2, %v269_v0  ;;  %v90_v10 = vrot.slane %v76_v2, 2  ;;  %v96_v15 = vrot.slane %v84_v6, 2 }
  0x80   :  { %v80_v5 = vpop.permute.xlu0 %79 }
  0x81   :  { %v82_v7 = vadd.f32 %v80_v5, %v78_v4  ;;  %v93_v12 = vrot.slane %v80_v5, 2 }
  0x83   :  { %v86_v9 = vadd.f32 %v84_v6, %v82_v7 }
  0x85   :  { %v89_v11 = vadd.f32 %v87_v8, %v86_v9 }
  0x87   :  { %v92_v13 = vadd.f32 %v90_v10, %v89_v11 }
  0x89   :  { %v95_v14 = vadd.f32 %v93_v12, %v92_v13 }
  0x8b   :  { %v98_v16 = vadd.f32 %v96_v15, %v95_v14 }
  0x8d   :  { %v99_v17 = vmul.f32 0.125, %v98_v16 }
  0x8f   :  { %v143_v18 = vsub.f32 %v96_v15, %v99_v17  ;;  %114 = vrot.lane.b32.xlu2 %v99_v17, %s240_s0  ;;  %104 = vrot.lane.b32.xlu1 %v99_v17, %s239_s20  ;;  %v134_v19 = vsub.f32 %v87_v8, %v99_v17  ;;  %v137_v20 = vsub.f32 %v90_v10, %v99_v17 }
  0x90   :  { %v140_v21 = vsub.f32 %v93_v12, %v99_v17  ;;  %v100_v44 = vsub.f32 %v269_v0, %v99_v17 }
  0x91   :  { %v135_v51 = vmul.f32 %v134_v19, %v134_v19  ;;  %v138_v53 = vmul.f32 %v137_v20, %v137_v20  ;;  %v144_v56 = vmul.f32 %v143_v18, %v143_v18 }
  0x92   :  { %v101_v46 = vmul.f32 %v100_v44, %v100_v44  ;;  %v141_v55 = vmul.f32 %v140_v21, %v140_v21 }
  0x97   :  { %124 = vrot.lane.b32.xlu2 %v99_v17, %s238_s19 }
  0xab   :  { %v40_v33 = vpop.xlane.xlu0 %39 }
  0xac   :  { %v41_v34 = vsub.f32 %v35_v1, %v40_v33 }
  0xae   :  { %v42_v35 = vmul.f32 1.442695, %v41_v34 }
  0xb0   :  { %193 = vpow2.f32 %v42_v35 }
  0xb6   :  { %v194_v36 = vpop.eup %193 }
  0xb7   :  { %v44_v37 = vsel %vm37_vm0, %v194_v36, 0.0 }
  0xe9   :  { %v115_v23 = vpop.permute.xlu2 %114 }
  0xea   :  { %v117_v24 = vsub.f32 %v269_v0, %v115_v23 }
  0xec   :  { %v118_v25 = vmul.f32 %v117_v24, %v117_v24 }
  0xee   :  { %120 = vrot.lane.b32.xlu2 %v118_v25, %s240_s0 }
  0xf1   :  { %v125_v30 = vpop.permute.xlu2 %124 }
  0xf2   :  { %v127_v31 = vsub.f32 %v269_v0, %v125_v30 }
  0xf4   :  { %v128_v32 = vmul.f32 %v127_v31, %v127_v31 }
  0xf6   :  { %53 = vperm.xlu2 %191, %v36_v26  }
 0x101   :  { %v105_v27 = vpop.permute.xlu1 %104 }
 0x102   :  { %v107_v28 = vsub.f32 %v269_v0, %v105_v27 }
 0x104   :  { %v108_v29 = vmul.f32 %v107_v28, %v107_v28 }
 0x106   :  { %110 = vrot.lane.b32.xlu1 %v108_v29, %s238_s19 }
 0x10e   :  { %130 = vrot.lane.b32.xlu1 %v128_v32, %s239_s20 }
 0x138   :  { %45 = vadd.xlane.f32.xlu1 %v44_v37 }
 0x148   :  { %v121_v38 = vpop.permute.xlu2 %120 }
 0x150   :  { %v54_v41 = vpop.permute.xlu2 %53 }
 0x151   :  { %vm55_vm1 = vcmp.eq.s32.totalorder %v51_v40, %v54_v41 }
 0x152   :  { %v56_v42 = vsel %vm55_vm1, %v35_v1, 0.0 }
 0x153   :  { %v57_v43 = vsel %vm37_vm0, %v56_v42, 0.0 }
 0x154   :  { %58 = vadd.xlane.f32.xlu2 %v57_v43 }
 0x178   :  { %v111_v45 = vpop.permute.xlu1 %110 }
 0x179   :  { %v113_v47 = vadd.f32 %v111_v45, %v101_v46 }
 0x17b   :  { %v123_v48 = vadd.f32 %v121_v38, %v113_v47 }
 0x180   :  { %v131_v49 = vpop.permute.xlu1 %130 }
 0x181   :  { %v133_v50 = vadd.f32 %v131_v49, %v123_v48 }
 0x183   :  { %v136_v52 = vadd.f32 %v135_v51, %v133_v50 }
 0x185   :  { %v139_v54 = vadd.f32 %v138_v53, %v136_v52 }
 0x187   :  { %v142_v57 = vadd.f32 %v141_v55, %v139_v54 }
 0x189   :  { %v145_v58 = vadd.f32 %v144_v56, %v142_v57 }
 0x18b   :  { %v147_v59 = vsel %vm146_vm2, %v145_v58, 0.0 }
 0x18c   :  { %148 = vadd.xlane.f32.xlu0 %v147_v59 }
 0x1ab   :  { %v46_v60 = vpop.xlane.xlu1 %45 }
 0x1ac   :  { %195 = vlog2.f32 %v46_v60 }
 0x1b2   :  { %v196_v61 = vpop.eup %195 }
 0x1b3   :  { %v48_v62 = vmul.f32 0.6931472, %v196_v61 }
 0x1b5   :  { %v49_v0 = vadd.f32 %v48_v62, %v40_v33 }
 0x1c7   :  { %v59_v1 = vpop.xlane.xlu2 %58 }
 0x1c8   :  { %v60_v2 = vsub.f32 %v49_v0, %v59_v1 }
 0x1ca   :  { %v61_v3 = vsel %vm34_vm3, %v60_v2, 0.0 }
 0x1cb   :  { %v63_v4 = vsel %vm62_vm4, %v61_v3, 0.0 }
 0x1cc   :  { %64 = vadd.xlane.f32.xlu0 %v63_v4 }
 0x1ff   :  { %v149_v5 = vpop.xlane.xlu0 %148 }
 0x200   :  { %v150_v6 = vsel %vm34_vm3, %v149_v5, 0.0 }
 0x201   :  { %v151_v7 = vsel %vm62_vm4, %v150_v6, 0.0 }
 0x202   :  { %152 = vadd.xlane.f32.xlu2 %v151_v7 }
 0x23f   :  { %v65_v8 = vpop.xlane.xlu0 %64 }
 0x240   :  { %v66_v9 = vrot.slane %v65_v8, 4 }
 0x242   :  { %v67_v10 = vadd.f32 %v66_v9, %v65_v8 }
 0x244   :  { %v68_v11 = vrot.slane %v67_v10, 2 }
 0x246   :  { %v69_v12 = vadd.f32 %v68_v11, %v67_v10 }
 0x248   :  { %v70_v13 = vrot.slane %v69_v12, 1 }
 0x24a   :  { %v71_v14 = vadd.f32 %v70_v13, %v69_v12 }
 0x24c   :  { %181 = vpush %v71_v14 }
 0x275   :  { %v153_v15 = vpop.xlane.xlu2 %152 }
 0x276   :  { %v154_v16 = vrot.slane %v153_v15, 4 }
 0x278   :  { %v155_v17 = vadd.f32 %v154_v16, %v153_v15 }
 0x27a   :  { %v156_v18 = vrot.slane %v155_v17, 2 }
 0x27c   :  { %v157_v19 = vadd.f32 %v156_v18, %v155_v17 }
 0x27d   :  { %s182_s1 = spop %181 }
 0x27e   :  { %162 = sst [smem:[#allocation5]] %s182_s1  ;;  %v158_v20 = vrot.slane %v157_v19, 1 }
 0x280   :  { %v159_v21 = vadd.f32 %v158_v20, %v157_v19 }
 0x282   :  { %183 = vpush %v159_v21 }
 0x2b3   :  { %s184_s25 = spop %183 }
 0x2b4   :  { %164 = sst [smem:[#allocation5 + $0x1]] %s184_s25 }
 0x2b5   :  { %173 = dma.smem_to_hbm %s242_s26, 16, %s171_s24, [#allocation4]  }
 0x2b6   :  { %235 = dma.done.wait [#allocation4], 16  }
 0x2b7   :  { %236 = vsyncadd [#allocation4], 4294967280 }
 0x2b8   :  { %178 = sfence }
 0x2b9   :  { %179 = vsyncpa [#allocation3], 1 }
 0x2ba   :  { %180 = vsyncpa [#allocation4], 1 }

</bundles_post_ra>
